<compile_context>
chip_gen: v7x
topology: tpu7x:2x2x1
jax: 0.10.0
libtpu: 0.0.40
codegen_flags: <defaults>
</compile_context>

<pallas_src>
import functools

import jax
import jax.numpy as jnp
import numpy as np
from jax.experimental import pallas as pl
from jax.experimental.pallas import tpu as pltpu


def _round_up(x, m):
    return ((x + m - 1) // m) * m


def _multibox_loss_kernel(conf_ref, lab_ref, ploc_ref, gloc_ref, out_ref,
                          *, num_priors):
    """One (image, prior-tile) grid step: accumulate (reg, cls, num_pos)."""
    i = pl.program_id(1)  # prior-tile index along the 'arbitrary' axis

    @pl.when(i == 0)
    def _init():
        out_ref[...] = jnp.zeros_like(out_ref)

    conf = conf_ref[...].astype(jnp.float32)          # (tile_p, C)
    labels = lab_ref[...].astype(jnp.int32)           # (tile_p, 1)
    tp, C = conf.shape

    valid = labels >= 0                               # (tile_p, 1) bool
    pos = labels > 0
    if num_priors % tp != 0:
        # The last tile overruns the prior axis; its out-of-bounds rows hold
        # unspecified VMEM data, so mask them with a global prior-index iota.
        row = i * tp + jax.lax.broadcasted_iota(jnp.int32, (tp, 1), 0)
        in_b = row < num_priors
        valid = jnp.logical_and(valid, in_b)
        pos = jnp.logical_and(pos, in_b)

    # ---- classification: cross-entropy, classes on the lane axis ----
    m = jnp.max(conf, axis=-1, keepdims=True)                              # (tp,1)
    lse = m + jnp.log(jnp.sum(jnp.exp(conf - m), axis=-1, keepdims=True))  # (tp,1)
    class_ids = jax.lax.broadcasted_iota(jnp.int32, (tp, C), 1)            # (tp,C)
    label_logit = jnp.sum(jnp.where(class_ids == labels, conf, 0.0),
                          axis=-1, keepdims=True)                          # (tp,1)
    # where() (not multiply) so NaN/Inf from garbage tail rows cannot leak.
    ce = jnp.where(valid, lse - label_logit, 0.0)                          # (tp,1)

    # ---- regression: smooth L1 (beta = 1), positive priors only ----
    d = jnp.abs(ploc_ref[...].astype(jnp.float32)
                - gloc_ref[...].astype(jnp.float32))                       # (tp,4)
    sl1 = jnp.where(d < 1.0, 0.5 * d * d, d - 0.5)                         # (tp,4)
    sl1_row = jnp.sum(sl1, axis=-1, keepdims=True)                         # (tp,1)
    reg = jnp.where(pos, sl1_row, 0.0)
    npos = jnp.where(pos, 1.0, 0.0)

    # ---- pack the three partials into one lane-packed (1, 3) update ----
    reg_s = jnp.sum(reg, axis=0, keepdims=True)       # (1,1)
    cls_s = jnp.sum(ce, axis=0, keepdims=True)        # (1,1)
    np_s = jnp.sum(npos, axis=0, keepdims=True)       # (1,1)
    lane = jax.lax.broadcasted_iota(jnp.int32, (1, 3), 1)
    partial = (jnp.where(lane == 0, reg_s, 0.0)
               + jnp.where(lane == 1, cls_s, 0.0)
               + jnp.where(lane == 2, np_s, 0.0))     # (1,3)
    out_ref[...] += partial


def multibox_loss(confidence, predicted_locations, labels, gt_locations,
                  *, max_tile_priors=8192):
    """confidence: (B,P,C), predicted_locations/gt_locations: (B,P,4),
    labels: (B,P) int.  Returns (smooth_l1_loss/num_pos, cls_loss/num_pos)."""
    B, P, C = confidence.shape

    # Tile the prior axis; 128-granular so f32/bf16/int8 tilings all align.
    tile_p = min(max_tile_priors, _round_up(P, 128))
    num_tiles = pl.cdiv(P, tile_p)

    # Labels are the only array the wrapper touches: shrink the stream
    # (int8 covers real SSD class counts; ignore label -1 is preserved).
    lab_dtype = jnp.int8 if C <= 127 else jnp.int32
    lab3d = labels.astype(lab_dtype).reshape(B, P, 1)

    kernel = functools.partial(_multibox_loss_kernel, num_priors=P)

    out = pl.pallas_call(
        kernel,
        grid=(B, num_tiles),
        in_specs=[
            pl.BlockSpec((None, tile_p, C), lambda b, i: (b, i, 0)),
            pl.BlockSpec((None, tile_p, 1), lambda b, i: (b, i, 0)),
            pl.BlockSpec((None, tile_p, 4), lambda b, i: (b, i, 0)),
            pl.BlockSpec((None, tile_p, 4), lambda b, i: (b, i, 0)),
        ],
        out_specs=pl.BlockSpec((None, 1, 3), lambda b, i: (b, 0, 0)),
        out_shape=jax.ShapeDtypeStruct((B, 1, 3), jnp.float32),
        compiler_params=pltpu.CompilerParams(
            dimension_semantics=("parallel", "arbitrary"),
            vmem_limit_bytes=48 * 1024 * 1024,
        ),
    )(confidence, lab3d, predicted_locations, gt_locations)

    totals = jnp.sum(out, axis=(0, 1))                # (3,): [reg, cls, num_pos]
    num_pos = totals[2]
    # Exact divide; num_pos == 0 -> inf/nan, same as the PyTorch reference.
    return totals[0] / num_pos, totals[1] / num_pos


def multibox_loss_reference(confidence, predicted_locations, labels, gt_locations):
    logp = jax.nn.log_softmax(confidence.astype(jnp.float32), axis=2)
    ce = -jnp.take_along_axis(logp, labels[..., None].astype(jnp.int32), axis=2)[..., 0]
    valid = labels >= 0
    cls = jnp.sum(jnp.where(valid, ce, 0.0))
    pos = labels > 0
    d = jnp.abs(predicted_locations.astype(jnp.float32)
                - gt_locations.astype(jnp.float32))
    sl1 = jnp.where(d < 1.0, 0.5 * d * d, d - 0.5)
    reg = jnp.sum(sl1 * pos[..., None].astype(jnp.float32))
    num_pos = jnp.sum(pos).astype(jnp.float32)
    return reg / num_pos, cls / num_pos


if __name__ == "__main__":
    key = jax.random.PRNGKey(0)
    k1, k2, k3, k4 = jax.random.split(key, 4)

    batch, num_priors, num_classes = 2, 128, 8
    confidence = jax.random.normal(k1, (batch, num_priors, num_classes), jnp.float32)
    predicted_locations = jax.random.normal(k2, (batch, num_priors, 4), jnp.float32)
    gt_locations = jax.random.normal(k3, (batch, num_priors, 4), jnp.float32)
    # labels in [0, num_classes): 0 = background (negative), >0 = positive
    labels = jax.random.randint(k4, (batch, num_priors), 0, num_classes, jnp.int32)

    reg_loss, cls_loss = multibox_loss(confidence, predicted_locations,
                                       labels, gt_locations)
    reg_loss, cls_loss = jax.block_until_ready((reg_loss, cls_loss))

    reg_ref, cls_ref = multibox_loss_reference(
        confidence, predicted_locations, labels, gt_locations)
    np.testing.assert_allclose(np.asarray(reg_loss), np.asarray(reg_ref),
                               rtol=2e-5, atol=2e-5)
    np.testing.assert_allclose(np.asarray(cls_loss), np.asarray(cls_ref),
                               rtol=2e-5, atol=2e-5)

    print("KERNEL_OK")
</pallas_src>

<mosaic_0001>
module attributes {stable_mosaic.version = 11 : i64} {
  func.func @_multibox_loss_kernel(%arg0: i32, %arg1: i32, %arg2: memref<1x128x8xf32, #tpu.memory_space<vmem>>, %arg3: memref<1x128x1xi8, #tpu.memory_space<vmem>>, %arg4: memref<1x128x4xf32, #tpu.memory_space<vmem>>, %arg5: memref<1x128x4xf32, #tpu.memory_space<vmem>>, %arg6: memref<1x1x3xf32, #tpu.memory_space<vmem>>) attributes {dimension_semantics = [#tpu.dimension_semantics<parallel>, #tpu.dimension_semantics<arbitrary>], iteration_bounds = array<i64: 2, 1>, scalar_prefetch = 0 : i64, scratch_operands = 0 : i64, tpu.core_type = #tpu.core_type<tc>, window_params = [{transform_indices = @transform_0, window_bounds = array<i64: 1, 128, 8>}, {transform_indices = @transform_1, window_bounds = array<i64: 1, 128, 1>}, {transform_indices = @transform_2, window_bounds = array<i64: 1, 128, 4>}, {transform_indices = @transform_3, window_bounds = array<i64: 1, 128, 4>}, {transform_indices = @transform_4, window_bounds = array<i64: 1, 1, 3>}]} {
    %c0_i32 = arith.constant 0 : i32
    %0 = arith.cmpi eq, %arg1, %c0_i32 : i32
    %1 = arith.extui %0 : i1 to i32
    %c0_i32_0 = arith.constant 0 : i32
    %2 = arith.cmpi ne, %1, %c0_i32_0 : i32
    scf.if %2 {
      %cst_38 = arith.constant 0.000000e+00 : f32
      %85 = vector.broadcast %cst_38 : f32 to vector<1x3xf32>
      %c0_39 = arith.constant 0 : index
      %c0_40 = arith.constant 0 : index
      %c0_41 = arith.constant 0 : index
      %86 = vector.load %arg6[%c0_39, %c0_40, %c0_41] : memref<1x1x3xf32, #tpu.memory_space<vmem>>, vector<1x1x3xf32>
      %87 = vector.shape_cast %86 : vector<1x1x3xf32> to vector<1x3xf32>
      %88 = vector.shape_cast %85 : vector<1x3xf32> to vector<1x1x3xf32>
      tpu.vector_store %arg6[%c0_39, %c0_40, %c0_41], %88 {strides = array<i32>} : memref<1x1x3xf32, #tpu.memory_space<vmem>>, vector<1x1x3xf32>,
    } else {
    }
    %c0 = arith.constant 0 : index
    %c0_1 = arith.constant 0 : index
    %c0_2 = arith.constant 0 : index
    %3 = vector.load %arg2[%c0, %c0_1, %c0_2] : memref<1x128x8xf32, #tpu.memory_space<vmem>>, vector<1x128x8xf32>
    %4 = vector.shape_cast %3 : vector<1x128x8xf32> to vector<128x8xf32>
    %c0_3 = arith.constant 0 : index
    %c0_4 = arith.constant 0 : index
    %c0_5 = arith.constant 0 : index
    %5 = vector.load %arg3[%c0_3, %c0_4, %c0_5] : memref<1x128x1xi8, #tpu.memory_space<vmem>>, vector<1x128x1xi8>
    %6 = vector.shape_cast %5 : vector<1x128x1xi8> to vector<128x1xi8>
    %7 = arith.extsi %6 : vector<128x1xi8> to vector<128x1xi32>
    %c0_i32_6 = arith.constant 0 : i32
    %8 = vector.broadcast %c0_i32_6 : i32 to vector<128x1xi32>
    %9 = arith.cmpi sge, %7, %8 : vector<128x1xi32>
    %c0_i32_7 = arith.constant 0 : i32
    %10 = vector.broadcast %c0_i32_7 : i32 to vector<128x1xi32>
    %11 = arith.cmpi sgt, %7, %10 : vector<128x1xi32>
    %cst = arith.constant dense<0xFF800000> : vector<128xf32>
    %12 = vector.multi_reduction <maximumf>, %4, %cst [1] : vector<128x8xf32> to vector<128xf32>
    %13 = vector.shape_cast %12 : vector<128xf32> to vector<128x1xf32>
    %14 = vector.broadcast %13 : vector<128x1xf32> to vector<128x8xf32>
    %15 = arith.subf %4, %14 : vector<128x8xf32>
    %16 = math.exp %15 : vector<128x8xf32>
    %cst_8 = arith.constant dense<0.000000e+00> : vector<128xf32>
    %17 = vector.multi_reduction <add>, %16, %cst_8 [1] : vector<128x8xf32> to vector<128xf32>
    %18 = vector.shape_cast %17 : vector<128xf32> to vector<128x1xf32>
    %19 = math.log %18 : vector<128x1xf32>
    %20 = arith.addf %13, %19 : vector<128x1xf32>
    %21 = tpu.iota {dimensions = array<i32: 1>} : vector<128x8xi32>
    %22 = vector.broadcast %7 : vector<128x1xi32> to vector<128x8xi32>
    %23 = arith.cmpi eq, %21, %22 : vector<128x8xi32>
    %cst_9 = arith.constant 0.000000e+00 : f32
    %24 = vector.broadcast %cst_9 : f32 to vector<128x8xf32>
    %25 = arith.select %23, %4, %24 : vector<128x8xi1>, vector<128x8xf32>
    %cst_10 = arith.constant dense<0.000000e+00> : vector<128xf32>
    %26 = vector.multi_reduction <add>, %25, %cst_10 [1] : vector<128x8xf32> to vector<128xf32>
    %27 = vector.shape_cast %26 : vector<128xf32> to vector<128x1xf32>
    %28 = arith.subf %20, %27 : vector<128x1xf32>
    %cst_11 = arith.constant 0.000000e+00 : f32
    %29 = vector.broadcast %cst_11 : f32 to vector<128x1xf32>
    %30 = arith.select %9, %28, %29 : vector<128x1xi1>, vector<128x1xf32>
    %c0_12 = arith.constant 0 : index
    %c0_13 = arith.constant 0 : index
    %c0_14 = arith.constant 0 : index
    %31 = vector.load %arg4[%c0_12, %c0_13, %c0_14] : memref<1x128x4xf32, #tpu.memory_space<vmem>>, vector<1x128x4xf32>
    %32 = vector.shape_cast %31 : vector<1x128x4xf32> to vector<128x4xf32>
    %c0_15 = arith.constant 0 : index
    %c0_16 = arith.constant 0 : index
    %c0_17 = arith.constant 0 : index
    %33 = vector.load %arg5[%c0_15, %c0_16, %c0_17] : memref<1x128x4xf32, #tpu.memory_space<vmem>>, vector<1x128x4xf32>
    %34 = vector.shape_cast %33 : vector<1x128x4xf32> to vector<128x4xf32>
    %35 = arith.subf %32, %34 : vector<128x4xf32>
    %36 = math.absf %35 : vector<128x4xf32>
    %cst_18 = arith.constant 1.000000e+00 : f32
    %37 = vector.broadcast %cst_18 : f32 to vector<128x4xf32>
    %38 = arith.cmpf olt, %36, %37 : vector<128x4xf32>
    %cst_19 = arith.constant 5.000000e-01 : f32
    %39 = vector.broadcast %cst_19 : f32 to vector<128x4xf32>
    %40 = arith.mulf %39, %36 : vector<128x4xf32>
    %41 = arith.mulf %40, %36 : vector<128x4xf32>
    %cst_20 = arith.constant 5.000000e-01 : f32
    %42 = vector.broadcast %cst_20 : f32 to vector<128x4xf32>
    %43 = arith.subf %36, %42 : vector<128x4xf32>
    %44 = arith.select %38, %41, %43 : vector<128x4xi1>, vector<128x4xf32>
    %cst_21 = arith.constant dense<0.000000e+00> : vector<128xf32>
    %45 = vector.multi_reduction <add>, %44, %cst_21 [1] : vector<128x4xf32> to vector<128xf32>
    %46 = vector.shape_cast %45 : vector<128xf32> to vector<128x1xf32>
    %cst_22 = arith.constant 0.000000e+00 : f32
    %47 = vector.broadcast %cst_22 : f32 to vector<128x1xf32>
    %48 = arith.select %11, %46, %47 : vector<128x1xi1>, vector<128x1xf32>
    %cst_23 = arith.constant 1.000000e+00 : f32
    %cst_24 = arith.constant 0.000000e+00 : f32
    %49 = vector.broadcast %cst_23 : f32 to vector<128x1xf32>
    %50 = vector.broadcast %cst_24 : f32 to vector<128x1xf32>
    %51 = arith.select %11, %49, %50 : vector<128x1xi1>, vector<128x1xf32>
    %cst_25 = arith.constant dense<0.000000e+00> : vector<1xf32>
    %52 = vector.multi_reduction <add>, %48, %cst_25 [0] : vector<128x1xf32> to vector<1xf32>
    %53 = vector.shape_cast %52 : vector<1xf32> to vector<1x1xf32>
    %cst_26 = arith.constant dense<0.000000e+00> : vector<1xf32>
    %54 = vector.multi_reduction <add>, %30, %cst_26 [0] : vector<128x1xf32> to vector<1xf32>
    %55 = vector.shape_cast %54 : vector<1xf32> to vector<1x1xf32>
    %cst_27 = arith.constant dense<0.000000e+00> : vector<1xf32>
    %56 = vector.multi_reduction <add>, %51, %cst_27 [0] : vector<128x1xf32> to vector<1xf32>
    %57 = vector.shape_cast %56 : vector<1xf32> to vector<1x1xf32>
    %58 = tpu.iota {dimensions = array<i32: 1>} : vector<1x3xi32>
    %c0_i32_28 = arith.constant 0 : i32
    %59 = vector.broadcast %c0_i32_28 : i32 to vector<1x3xi32>
    %60 = arith.cmpi eq, %58, %59 : vector<1x3xi32>
    %cst_29 = arith.constant 0.000000e+00 : f32
    %61 = vector.shape_cast %53 : vector<1x1xf32> to vector<1x1xf32>
    %62 = vector.broadcast %61 : vector<1x1xf32> to vector<1x3xf32>
    %63 = vector.broadcast %cst_29 : f32 to vector<1x3xf32>
    %64 = arith.select %60, %62, %63 : vector<1x3xi1>, vector<1x3xf32>
    %c1_i32 = arith.constant 1 : i32
    %65 = vector.broadcast %c1_i32 : i32 to vector<1x3xi32>
    %66 = arith.cmpi eq, %58, %65 : vector<1x3xi32>
    %cst_30 = arith.constant 0.000000e+00 : f32
    %67 = vector.shape_cast %55 : vector<1x1xf32> to vector<1x1xf32>
    %68 = vector.broadcast %67 : vector<1x1xf32> to vector<1x3xf32>
    %69 = vector.broadcast %cst_30 : f32 to vector<1x3xf32>
    %70 = arith.select %66, %68, %69 : vector<1x3xi1>, vector<1x3xf32>
    %71 = arith.addf %64, %70 : vector<1x3xf32>
    %c2_i32 = arith.constant 2 : i32
    %72 = vector.broadcast %c2_i32 : i32 to vector<1x3xi32>
    %73 = arith.cmpi eq, %58, %72 : vector<1x3xi32>
    %cst_31 = arith.constant 0.000000e+00 : f32
    %74 = vector.shape_cast %57 : vector<1x1xf32> to vector<1x1xf32>
    %75 = vector.broadcast %74 : vector<1x1xf32> to vector<1x3xf32>
    %76 = vector.broadcast %cst_31 : f32 to vector<1x3xf32>
    %77 = arith.select %73, %75, %76 : vector<1x3xi1>, vector<1x3xf32>
    %78 = arith.addf %71, %77 : vector<1x3xf32>
    %c0_32 = arith.constant 0 : index
    %c0_33 = arith.constant 0 : index
    %c0_34 = arith.constant 0 : index
    %79 = vector.load %arg6[%c0_32, %c0_33, %c0_34] : memref<1x1x3xf32, #tpu.memory_space<vmem>>, vector<1x1x3xf32>
    %80 = vector.shape_cast %79 : vector<1x1x3xf32> to vector<1x3xf32>
    %81 = arith.addf %80, %78 : vector<1x3xf32>
    %c0_35 = arith.constant 0 : index
    %c0_36 = arith.constant 0 : index
    %c0_37 = arith.constant 0 : index
    %82 = vector.load %arg6[%c0_35, %c0_36, %c0_37] : memref<1x1x3xf32, #tpu.memory_space<vmem>>, vector<1x1x3xf32>
    %83 = vector.shape_cast %82 : vector<1x1x3xf32> to vector<1x3xf32>
    %84 = vector.shape_cast %81 : vector<1x3xf32> to vector<1x1x3xf32>
    tpu.vector_store %arg6[%c0_35, %c0_36, %c0_37], %84 {strides = array<i32>} : memref<1x1x3xf32, #tpu.memory_space<vmem>>, vector<1x1x3xf32>,
    return
  }
  func.func @transform_0(%arg0: i32, %arg1: i32) -> (i32, i32, i32) {
    %c0_i32 = arith.constant 0 : i32
    %c0_i32_0 = arith.constant 0 : i32
    return %arg0, %arg1, %c0_i32 : i32, i32, i32
  }
  func.func @transform_1(%arg0: i32, %arg1: i32) -> (i32, i32, i32) {
    %c0_i32 = arith.constant 0 : i32
    %c0_i32_0 = arith.constant 0 : i32
    return %arg0, %arg1, %c0_i32 : i32, i32, i32
  }
  func.func @transform_2(%arg0: i32, %arg1: i32) -> (i32, i32, i32) {
    %c0_i32 = arith.constant 0 : i32
    %c0_i32_0 = arith.constant 0 : i32
    return %arg0, %arg1, %c0_i32 : i32, i32, i32
  }
  func.func @transform_3(%arg0: i32, %arg1: i32) -> (i32, i32, i32) {
    %c0_i32 = arith.constant 0 : i32
    %c0_i32_0 = arith.constant 0 : i32
    return %arg0, %arg1, %c0_i32 : i32, i32, i32
  }
  func.func @transform_4(%arg0: i32, %arg1: i32) -> (i32, i32, i32) {
    %c0_i32 = arith.constant 0 : i32
    %c0_i32_0 = arith.constant 0 : i32
    %c0_i32_1 = arith.constant 0 : i32
    return %arg0, %c0_i32, %c0_i32_0 : i32, i32, i32
  }
}

</mosaic_0001>

<bundles_post_ra>
// kernel: tpu_custom_call.1
= control target key start
LH: loop header
LB: loop body
LE: loop exit
PB: predicated region body
PF: predicated region fallthrough
CT: control target
= control target key end

     0   :  { %9 = vsyncpa [#allocation3], 0  ;;  %s2256_s0 = inlined_call_operand.vmem [shape: f32[2,128,8], index: 0, kind: input, shape index: {}]   ;;  %s2257_s1 = inlined_call_operand.vmem [shape: s8[2,128,1], index: 1, kind: input, shape index: {}]   ;;  %s2258_s2 = inlined_call_operand.vmem [shape: f32[2,128,4], index: 2, kind: input, shape index: {}]   ;;  %s2259_s3 = inlined_call_operand.vmem [shape: f32[2,128,4], index: 3, kind: input, shape index: {}]   ;;  %s2260_s4 = inlined_call_operand.hbm [shape: f32[2,1,3], index: 4, kind: output, shape index: {}]  }
   0x1   :  { %11 = vsyncpa [#allocation3 + $0x1], 0  ;;  %s1578_s15 = smov 0   ;;  %s1580_s16 = smov 0  }
   0x2   :  { %s1582_s17 = smov 0   ;;  %s1584_s18 = smov 0  }
   0x3   :  { %s1586_s19 = smov 0   ;;  %s1588_s20 = smov 0  }
   0x4 LB: > { %s1272_s21 = sadd.s32 4294967295, %s1548_s20   ;;  %s1273_s22 = sadd.s32 4294967294, %s1548_s20   ;;  %s1548_s20 = sphi %s1588_s20, %s17_s20   ;;  %s1544_s19 = sphi %s1586_s19, %s2277_s19   ;;  %s1540_s18 = sphi %s1584_s18, %s2276_s18   ;;  %s1536_s17 = sphi %s1582_s17, %s2275_s17   ;;  %s1532_s16 = sphi %s1580_s16, %s2274_s16   ;;  %s1528_s15 = sphi %s1578_s15, %s2273_s15  }
   0x5   : > { %s29_s23 = sadd.s32 1, %s1544_s19  ;;  %s148_s24 = sadd.s32 1, %s1536_s17 }
   0x6   : > { %p31_p0 = scmp.ge.s32.totalorder %s29_s23, 2  ;;  %p158_p1 = scmp.ne.s32.totalorder %s1536_s17, %s1532_s16 }
   0x7   : > { %p159_p2 = scmp.eq.s32.totalorder %s1272_s21, 1  ;;  %p164_p3 = scmp.ne.s32.totalorder %s1532_s16, %s1528_s15 }
   0x8   : > { %s2279_s23 = smov (%p31_p0, %s29_s23), 0  ;;  %p165_p5 = scmp.eq.s32.totalorder %s1273_s22, 1 }
   0x9   : > { %p1618_p4 = por %p159_p2, %p158_p1  ;;  %s145_s26 = ssub.s32 %s1544_s19, %s2279_s23 }
   0xa   : > { %p1276_p6 = scmp.ge.s32.totalorder %s1548_s20, 1  ;;  %p146_p7 = scmp.eq.s32.totalorder %s145_s26, 0 }
   0xb   : > { %p1625_p8 = por %p165_p5, %p164_p3  ;;  %p235_p9 = scmp.lt.s32.totalorder %s1548_s20, 3 }
   0xc   : > { %s1631_s28 = scalar_select %p146_p7, %s1536_s17, %s148_s24  }
   0xd   : > { %p236_p10 = pnand %p1276_p6, %p235_p9 }
   0xf   : > { %239 = sbr.rel (%p236_p10) target bundleno = 604 (0x25c), region = 36 }
  0x16   : > { %p292_p11 = scmp.lt.s32.totalorder %s1540_s18, 1  ;;  %v1550_v0 = vmov 0   ;;  %vm417_vm0 = vcmask 64512   ;;  %vm916_vm2 = vcmask 31744   ;;  %s289_s26 = sand.u32 1, %s1532_s16  }
  0x17   : > { %1405 = vset.pattern.permute.xlu1 %v1550_v0  ;;  %1404 = vset.pattern.permute.xlu0 %v1550_v0  ;;  %s1137_s9 = scalar_lea.sflag [#allocation3], %s289_s26 }
  0x18   : > { %s1635_s29 = scalar_select %p292_p11, %s1540_s18, 1 }
  0x1a   : > { %s1638_s30 = sshll.u32 %s1635_s29, 7  ;;  %s1305_s8 = sshll.u32 %s1635_s29, 5 }
  0x1b   : > { %s1644_s7 = scalar_lea.vmem %s2256_s0, %s1638_s30  ;;  %s309_s11 = scalar_lea.vmem %s2257_s1, %s1305_s8 }
  0x1c   : > { %v1647_v1 = vld [vmem:[%s1644_s7 + $0x10] sm:$0xff]  ;;  %v1650_v2 = vld [vmem:[%s1644_s7] sm:$0xff]  ;;  %v1653_v3 = vld [vmem:[%s1644_s7 + $0x18] sm:$0xff]  ;;  %s1769_s14 = scalar_lea.vmem %s2258_s2, %s1638_s30  ;;  %s1775_s24 = scalar_lea.vmem %s2259_s3, %s1638_s30 }
  0x1d   : > { %v424_v4 = vsel %vm417_vm0, %v1647_v1, -inf  ;;  %v418_v5 = vsel %vm417_vm0, %v1650_v2, -inf  ;;  %v1660_v6 = vld [vmem:[%s1644_s7 + $0x8] sm:$0xff]  ;;  %v427_v7 = vsel %vm417_vm0, %v1653_v3, -inf  ;;  %v1670_v10 = vld [vmem:[%s1644_s7 + $0x20] sm:$0xff]  ;;  %v1677_v13 = vld [vmem:[%s1644_s7 + $0x38] sm:$0xff] }
  0x1e   : > { %425 = vmax.xlane.f32.xlu1 %v424_v4  ;;  %419 = vmax.xlane.f32.xlu0 %v418_v5  ;;  %v421_v8 = vsel %vm417_vm0, %v1660_v6, -inf  ;;  %v1667_v9 = vld [vmem:[%s1644_s7 + $0x28] sm:$0xff]  ;;  %v430_v12 = vsel %vm417_vm0, %v1670_v10, -inf  ;;  %v1680_v14 = vld [vmem:[%s1644_s7 + $0x30] sm:$0xff]  ;;  %v439_v15 = vsel %vm417_vm0, %v1677_v13, -inf  ;;  %v1690_v18 = vld [vmem:[%s1644_s7 + $0x40] sm:$0xff] }
  0x1f   : > { %v433_v11 = vsel %vm417_vm0, %v1667_v9, -inf  ;;  %v436_v16 = vsel %vm417_vm0, %v1680_v14, -inf  ;;  %v1687_v17 = vld [vmem:[%s1644_s7 + $0x48] sm:$0xff]  ;;  %v442_v20 = vsel %vm417_vm0, %v1690_v18, -inf  ;;  %v1697_v21 = vld [vmem:[%s1644_s7 + $0x58] sm:$0xff]  ;;  %v1700_v22 = vld [vmem:[%s1644_s7 + $0x50] sm:$0xff] }
  0x20   : > { %v445_v19 = vsel %vm417_vm0, %v1687_v17, -inf  ;;  %v451_v23 = vsel %vm417_vm0, %v1697_v21, -inf  ;;  %v448_v24 = vsel %vm417_vm0, %v1700_v22, -inf  ;;  %v1707_v25 = vld [vmem:[%s1644_s7 + $0x68] sm:$0xff]  ;;  %v1710_v26 = vld [vmem:[%s1644_s7 + $0x60] sm:$0xff]  ;;  %v1717_v29 = vld [vmem:[%s1644_s7 + $0x78] sm:$0xff] }
  0x21   : > { %v457_v27 = vsel %vm417_vm0, %v1707_v25, -inf  ;;  %v454_v28 = vsel %vm417_vm0, %v1710_v26, -inf  ;;  %v1720_v30 = vld [vmem:[%s1644_s7 + $0x70] sm:$0xff]  ;;  %v463_v31 = vsel %vm417_vm0, %v1717_v29, -inf  ;;  %v1309_v33 = vld [vmem:[%s309_s11] sm:$0xff]   ;;  %v1341_v40 = vld [vmem:[%s309_s11 + $0x8] sm:$0xff]  }
  0x22   : > { %428 = vmax.xlane.f32.xlu1 %v427_v7  ;;  %422 = vmax.xlane.f32.xlu0 %v421_v8  ;;  %v460_v32 = vsel %vm417_vm0, %v1720_v30, -inf  ;;  %v1730_v34 = vunpack.c.1.s8 %v1309_v33  ;;  %v1733_v35 = vunpack.c.2.s8 %v1309_v33  ;;  %v1735_v36 = vunpack.c.0.s8 %v1309_v33  ;;  %v1343_v37 = vld [vmem:[%s309_s11 + $0x10] sm:$0xff]   ;;  %v1345_v43 = vld [vmem:[%s309_s11 + $0x18] sm:$0xff]   ;;  %v773_v50 = vld [vmem:[%s1769_s14 + $0x8] sm:$0xff]  ;;  %s290_s29 = scalar_lea.vmem [#allocation2], %s289_s26  ;;  %s1301_s30 = sshll.u32 %s1540_s18, 4 }
  0x23   : > { %v1738_v38 = vunpack.c.3.s8 %v1309_v33  ;;  %v1741_v39 = vunpack.c.1.s8 %v1343_v37  ;;  %v1744_v41 = vunpack.c.0.s8 %v1341_v40  ;;  %v1747_v42 = vunpack.c.3.s8 %v1343_v37  ;;  %v789_v51 = vld [vmem:[%s1775_s24 + $0x8] sm:$0xff]  ;;  %v775_v54 = vld [vmem:[%s1769_s14 + $0x18] sm:$0xff]  ;;  %s1149_s5 = sshll.u32 %s290_s29, 4  ;;  %s2208_s8 = scalar_lea.hbm %s2260_s4, %s1301_s30  ;;  %s2210_s5 = int_to_ptr.vmem [resolvable:$true] %s1149_s5 }
  0x24   : > { %v1750_v44 = vunpack.c.1.s8 %v1341_v40  ;;  %v1753_v45 = vunpack.c.1.s8 %v1345_v43  ;;  %v1756_v46 = vunpack.c.2.s8 %v1341_v40  ;;  %v1759_v47 = vunpack.c.3.s8 %v1345_v43  ;;  %v791_v55 = vld [vmem:[%s1775_s24 + $0x18] sm:$0xff]  ;;  %s1470_s10 = scalar_lea.vmem %s2210_s5, 16  ;;  %s1552_s18 = smov [#allocation2]  }
  0x25   : > { %v1762_v48 = vunpack.c.3.s8 %v1341_v40  ;;  %v1778_v49 = vunpack.c.0.s8 %v1343_v37  ;;  %v1783_v52 = vunpack.c.2.s8 %v1343_v37  ;;  %v805_v53 = vsub.f32 %v773_v50, %v789_v51  ;;  %p1471_p12 = scmp.ne.s32.totalorder %s2210_s5, %s1470_s10  ;;  %s1474_s11 = sshll.u32 %s1552_s18, 4  ;;  %s1475_s11 = int_to_ptr.vmem [resolvable:$false] %s1474_s11 }
  0x26   : > { %434 = vmax.xlane.f32.xlu1 %v433_v11  ;;  %431 = vmax.xlane.f32.xlu0 %v430_v12  ;;  %v1788_v56 = vunpack.c.0.s8 %v1345_v43  ;;  %v807_v58 = vsub.f32 %v775_v54, %v791_v55  ;;  %v1791_v59 = vunpack.c.2.s8 %v1345_v43  ;;  %v772_v12 = vld [vmem:[%s1769_s14] sm:$0xff]  ;;  %s1476_s12 = scalar_lea.vmem %s1475_s11, 32  ;;  %p1477_p1 = scmp.lt.s32.totalorder %s2210_s5, %s1475_s11 }
  0x27   : > { %v821_v57 = vand.u32 2147483647, %v805_v53  ;;  %p1472_p13 = pnand %p1471_p12, %p1618_p4  ;;  %p1478_p2 = scmp.lt.s32.totalorder %s1476_s12, %s1470_s10 }
  0x28   : > { %v823_v61 = vand.u32 2147483647, %v807_v58 }
  0x29   : > { %v853_v60 = vmul.f32 0.5, %v821_v57  ;;  %v1286_v63 = vadd.f32 -0.5, %v821_v57  ;;  %vm837_vm1 = vcmp.lt.f32.partialorder %v821_v57, 1.0  ;;  %p1473_p0 = pneg %p1472_p13  ;;  %p1479_p3 = por %p1478_p2, %p1477_p1 }
  0x2a   : > { %440 = vmax.xlane.f32.xlu1 %v439_v15  ;;  %437 = vmax.xlane.f32.xlu0 %v436_v16  ;;  %v855_v0 = vmul.f32 0.5, %v823_v61  ;;  %v1288_v7 = vadd.f32 -0.5, %v823_v61  ;;  %vm839_vm3 = vcmp.lt.f32.partialorder %v823_v61, 1.0  ;;  %v788_v15 = vld [vmem:[%s1775_s24] sm:$0xff] }
  0x2b   : > { %v869_v62 = vmul.f32 %v853_v60, %v821_v57  ;;  %p1480_p5 = pnand %p1479_p3, %p1473_p0 }
  0x2c   : > { %v871_v5 = vmul.f32 %v855_v0, %v823_v61 }
  0x2d   : > { %v901_v4 = vsel %vm837_vm1, %v869_v62, %v1286_v63 }
  0x2e   : > { %446 = vmax.xlane.f32.xlu1 %v445_v19  ;;  %443 = vmax.xlane.f32.xlu0 %v442_v20  ;;  %v920_v8 = vsel %vm916_vm2, %v901_v4, 0.0  ;;  %v903_v11 = vsel %vm839_vm3, %v871_v5, %v1288_v7  ;;  %v804_v19 = vsub.f32 %v772_v12, %v788_v15  ;;  %v774_v20 = vld [vmem:[%s1769_s14 + $0x10] sm:$0xff] }
  0x2f   : > { %v926_v16 = vsel %vm916_vm2, %v903_v11, 0.0 }
  0x32   : > { %452 = vmax.xlane.f32.xlu1 %v451_v23  ;;  %449 = vmax.xlane.f32.xlu0 %v448_v24  ;;  %v790_v23 = vld [vmem:[%s1775_s24 + $0x10] sm:$0xff]  ;;  %v820_v24 = vand.u32 2147483647, %v804_v19 }
  0x34   : > { %v1285_v43 = vadd.f32 -0.5, %v820_v24  ;;  %vm836_vm4 = vcmp.lt.f32.partialorder %v820_v24, 1.0 }
  0x36   : > { %458 = vmax.xlane.f32.xlu1 %v457_v27  ;;  %455 = vmax.xlane.f32.xlu0 %v454_v28  ;;  %v806_v27 = vsub.f32 %v774_v20, %v790_v23  ;;  %v776_v28 = vld [vmem:[%s1769_s14 + $0x20] sm:$0xff] }
  0x38   : > { %v822_v33 = vand.u32 2147483647, %v806_v27 }
  0x3a   : > { %464 = vmax.xlane.f32.xlu1 %v463_v31  ;;  %461 = vmax.xlane.f32.xlu0 %v460_v32  ;;  %v792_v31 = vld [vmem:[%s1775_s24 + $0x20] sm:$0xff]  ;;  %v852_v32 = vmul.f32 0.5, %v820_v24  ;;  %v854_v50 = vmul.f32 0.5, %v822_v33  ;;  %v1287_v55 = vadd.f32 -0.5, %v822_v33  ;;  %vm838_vm5 = vcmp.lt.f32.partialorder %v822_v33, 1.0 }
  0x3b   : > { %v808_v37 = vsub.f32 %v776_v28, %v792_v31 }
  0x3c   : > { %v868_v40 = vmul.f32 %v852_v32, %v820_v24  ;;  %v870_v54 = vmul.f32 %v854_v50, %v822_v33  ;;  %v610_v32 = vlaneseq }
  0x3d   : > { %v824_v51 = vand.u32 2147483647, %v808_v37 }
  0x3e   : > { %v900_v53 = vsel %vm836_vm4, %v868_v40, %v1285_v43  ;;  %v902_v60 = vsel %vm838_vm5, %v870_v54, %v1287_v55  ;;  %v1837_v40 = vand.u32 127, %v610_v32 }
  0x3f   : > { %v856_v57 = vmul.f32 0.5, %v824_v51  ;;  %v917_v58 = vsel %vm916_vm2, %v900_v53, 0.0  ;;  %v1289_v62 = vadd.f32 -0.5, %v824_v51  ;;  %vm840_vm6 = vcmp.lt.f32.partialorder %v824_v51, 1.0 }
  0x40   : > { %v923_v63 = vsel %vm916_vm2, %v902_v60, 0.0 }
  0x41   : > { %v872_v61 = vmul.f32 %v856_v57, %v824_v51 }
  0x43   : > { %v904_v0 = vsel %vm840_vm6, %v872_v61, %v1289_v62 }
  0x44   : > { %v929_v4 = vsel %vm916_vm2, %v904_v0, 0.0 }
  0x4b   : > { %616 = vperm.xlu1 %1405, %v1730_v34  }
  0x4f   : > { %619 = vperm.xlu1 %1405, %v1733_v35  }
  0x50   : > { %613 = vperm.xlu0 %1404, %v1735_v36  }
  0x53   : > { %622 = vperm.xlu1 %1405, %v1738_v38  }
  0x54   : > { %640 = vperm.xlu0 %1404, %v1741_v39  }
  0x57   : > { %625 = vperm.xlu1 %1405, %v1744_v41  }
  0x58   : > { %646 = vperm.xlu0 %1404, %v1747_v42  }
  0x5b   : > { %628 = vperm.xlu1 %1405, %v1750_v44  }
  0x5c   : > { %652 = vperm.xlu0 %1404, %v1753_v45  }
  0x5f   : > { %631 = vperm.xlu1 %1405, %v1756_v46  }
  0x60   : > { %658 = vperm.xlu0 %1404, %v1759_v47  }
  0x63   : > { %634 = vperm.xlu1 %1405, %v1762_v48  }
  0x67   : > { %637 = vperm.xlu1 %1405, %v1778_v49  }
  0x6b   : > { %643 = vperm.xlu1 %1405, %v1783_v52  }
  0x6f   : > { %649 = vperm.xlu1 %1405, %v1788_v56  }
  0x73   : > { %655 = vperm.xlu1 %1405, %v1791_v59  }
  0x7f   : > { %921 = vadd.xlane.f32.xlu0 %v920_v8 }
  0x83   : > { %927 = vadd.xlane.f32.xlu0 %v926_v16 }
  0x97   : > { %918 = vadd.xlane.f32.xlu1 %v917_v58 }
  0x9b   : > { %924 = vadd.xlane.f32.xlu1 %v923_v63 }
  0x9f   : > { %930 = vadd.xlane.f32.xlu1 %v929_v4 }
  0xab   : > { %v1805_v5 = vpop.xlane.xlu1 %425  ;;  %v1807_v7 = vpop.xlane.xlu0 %419 }
  0xac   : > { %v466_v37 = vsub.f32 %v1650_v2, %v1807_v7  ;;  %v468_v58 = vsub.f32 %v1647_v1, %v1805_v5 }
  0xae   : > { %v482_v53 = vmul.f32 1.442695, %v466_v37 }
  0xaf   : > { %v1809_v8 = vpop.xlane.xlu1 %428  ;;  %v1811_v11 = vpop.xlane.xlu0 %422 }
  0xb0   : > { %v469_v51 = vsub.f32 %v1653_v3, %v1809_v8  ;;  %v467_v54 = vsub.f32 %v1660_v6, %v1811_v11  ;;  %1406 = vpow2.f32 %v482_v53 }
  0xb2   : > { %v488_v62 = vmul.f32 1.442695, %v469_v51  ;;  %v484_v0 = vmul.f32 1.442695, %v467_v54  ;;  %v486_v51 = vmul.f32 1.442695, %v468_v58 }
  0xb3   : > { %v1813_v12 = vpop.xlane.xlu1 %434  ;;  %v1815_v15 = vpop.xlane.xlu0 %431 }
  0xb4   : > { %v471_v63 = vsub.f32 %v1667_v9, %v1813_v12  ;;  %1408 = vpow2.f32 %v488_v62  ;;  %v470_v53 = vsub.f32 %v1670_v10, %v1815_v15 }
  0xb5   : > { %1410 = vpow2.f32 %v484_v0 }
  0xb6   : > { %1412 = vpow2.f32 %v486_v51 }
  0xb7   : > { %v1817_v16 = vpop.xlane.xlu1 %440  ;;  %v1819_v19 = vpop.xlane.xlu0 %437 }
  0xb8   : > { %v472_v58 = vsub.f32 %v1680_v14, %v1819_v19 }
  0xba   : > { %v1407_v0 = vpop.eup %1406 }
  0xbb   : > { %v1821_v20 = vpop.xlane.xlu1 %446  ;;  %v1823_v23 = vpop.xlane.xlu0 %443 }
  0xbc   : > { %v475_v62 = vsub.f32 %v1687_v17, %v1821_v20 }
  0xbf   : > { %v1825_v24 = vpop.xlane.xlu1 %452  ;;  %v1827_v27 = vpop.xlane.xlu0 %449 }
  0xc3   : > { %v1829_v28 = vpop.xlane.xlu1 %458  ;;  %v1831_v31 = vpop.xlane.xlu0 %455 }
  0xc7   : > { %v1833_v33 = vpop.xlane.xlu1 %464  ;;  %v1839_v43 = vpop.xlane.xlu0 %461 }
  0xc8   : > { %2267 = vst [vmem:[#allocation5_spill] sm:$0xff] %v1833_v33  ;;  %2268 = vst [vmem:[#allocation6_spill] sm:$0xff] %v1839_v43 }
  0xcb   : > { %v617_v50 = vpop.permute.xlu1 %616 }
  0xcc   : > { %vm661_vm7 = vcmp.eq.s32.totalorder %v1837_v40, %v617_v50 }
  0xcd   : > { %v677_v55 = vsel %vm661_vm7, %v1660_v6, 0.0 }
  0xce   : > { %v695_v57 = vsel %vm417_vm0, %v677_v55, 0.0  ;;  %v492_v55 = vmul.f32 1.442695, %v471_v63 }
  0xcf   : > { %v620_v60 = vpop.permute.xlu1 %619  ;;  %696 = vadd.xlane.f32.xlu0 %v695_v57  ;;  %v614_v61 = vpop.permute.xlu0 %613 }
  0xd0   : > { %vm662_vm8 = vcmp.eq.s32.totalorder %v1837_v40, %v620_v60  ;;  %vm660_vm9 = vcmp.eq.s32.totalorder %v1837_v40, %v614_v61  ;;  %v490_v60 = vmul.f32 1.442695, %v470_v53  ;;  %1414 = vpow2.f32 %v492_v55 }
  0xd1   : > { %v678_v6 = vsel %vm662_vm8, %v1647_v1, 0.0  ;;  %v676_v4 = vsel %vm660_vm9, %v1650_v2, 0.0  ;;  %v473_v1 = vsub.f32 %v1677_v13, %v1817_v16  ;;  %v514_v55 = vsel %vm417_vm0, %v1407_v0, 0.0 }
  0xd2   : > { %v698_v32 = vsel %vm417_vm0, %v678_v6, 0.0  ;;  %v692_v37 = vsel %vm417_vm0, %v676_v4, 0.0  ;;  %1416 = vpow2.f32 %v490_v60  ;;  %v494_v4 = vmul.f32 1.442695, %v472_v58 }
  0xd3   : > { %v623_v50 = vpop.permute.xlu1 %622  ;;  %699 = vadd.xlane.f32.xlu0 %v698_v32  ;;  %693 = vadd.xlane.f32.xlu1 %v692_v37  ;;  %v496_v61 = vmul.f32 1.442695, %v473_v1  ;;  %v474_v32 = vsub.f32 %v1690_v18, %v1823_v23  ;;  %v500_v37 = vmul.f32 1.442695, %v475_v62  ;;  %v479_v0 = vsub.f32 %v1707_v25, %v1829_v28 }
  0xd4   : > { %vm663_vm10 = vcmp.eq.s32.totalorder %v1837_v40, %v623_v50  ;;  %v476_v50 = vsub.f32 %v1700_v22, %v1827_v27 }
  0xd5   : > { %v679_v2 = vsel %vm663_vm10, %v1653_v3, 0.0  ;;  %1418 = vpow2.f32 %v496_v61 }
  0xd6   : > { %v701_v54 = vsel %vm417_vm0, %v679_v2, 0.0  ;;  %1420 = vpow2.f32 %v494_v4  ;;  %v477_v2 = vsub.f32 %v1697_v21, %v1825_v24  ;;  %v793_v4 = vld [vmem:[%s1775_s24 + $0x28] sm:$0xff] }
  0xd7   : > { %v626_v57 = vpop.permute.xlu1 %625  ;;  %702 = vadd.xlane.f32.xlu0 %v701_v54  ;;  %v498_v54 = vmul.f32 1.442695, %v474_v32  ;;  %1422 = vpow2.f32 %v500_v37 }
  0xd8   : > { %vm664_vm11 = vcmp.eq.s32.totalorder %v1837_v40, %v626_v57  ;;  %v502_v57 = vmul.f32 1.442695, %v476_v50 }
  0xd9   : > { %v680_v63 = vsel %vm664_vm11, %v1670_v10, 0.0  ;;  %v1409_v10 = vpop.eup %1408  ;;  %1424 = vpow2.f32 %v498_v54 }
  0xda   : > { %v704_v3 = vsel %vm417_vm0, %v680_v63, 0.0  ;;  %v1411_v1 = vpop.eup %1410  ;;  %v523_v61 = vsel %vm417_vm0, %v1409_v10, 0.0  ;;  %v504_v63 = vmul.f32 1.442695, %v477_v2  ;;  %1426 = vpow2.f32 %v502_v57  ;;  %v778_v57 = vld [vmem:[%s1769_s14 + $0x30] sm:$0xff] }
  0xdb   : > { %v629_v6 = vpop.permute.xlu1 %628  ;;  %705 = vadd.xlane.f32.xlu1 %v704_v3  ;;  %v1413_v60 = vpop.eup %1412  ;;  %v517_v58 = vsel %vm417_vm0, %v1411_v1, 0.0 }
  0xdc   : > { %vm665_vm12 = vcmp.eq.s32.totalorder %v1837_v40, %v629_v6  ;;  %v1415_v62 = vpop.eup %1414  ;;  %v777_v6 = vld [vmem:[%s1769_s14 + $0x28] sm:$0xff]  ;;  %v520_v37 = vsel %vm417_vm0, %v1413_v60, 0.0  ;;  %1428 = vpow2.f32 %v504_v63 }
  0xdd   : > { %v681_v51 = vsel %vm665_vm12, %v1667_v9, 0.0  ;;  %v478_v9 = vsub.f32 %v1710_v26, %v1831_v31  ;;  %v1417_v32 = vpop.eup %1416  ;;  %v529_v50 = vsel %vm417_vm0, %v1415_v62, 0.0  ;;  %v809_v10 = vsub.f32 %v777_v6, %v793_v4 }
  0xde   : > { %v707_v53 = vsel %vm417_vm0, %v681_v51, 0.0  ;;  %v526_v2 = vsel %vm417_vm0, %v1417_v32, 0.0  ;;  %v481_v32 = vsub.f32 %v1717_v29, %v1833_v33 }
  0xdf   : > { %708 = vadd.xlane.f32.xlu0 %v707_v53  ;;  %515 = vadd.xlane.f32.xlu1 %v514_v55  ;;  %v506_v3 = vmul.f32 1.442695, %v478_v9  ;;  %v1419_v51 = vpop.eup %1418  ;;  %v508_v53 = vmul.f32 1.442695, %v479_v0  ;;  %v480_v55 = vsub.f32 %v1720_v30, %v1839_v43  ;;  %v794_v9 = vld [vmem:[%s1775_s24 + $0x30] sm:$0xff]  ;;  %v781_v43 = vld [vmem:[%s1769_s14 + $0x48] sm:$0xff] }
  0xe0   : > { %v1421_v1 = vpop.eup %1420  ;;  %v535_v54 = vsel %vm417_vm0, %v1419_v51, 0.0  ;;  %v810_v62 = vsub.f32 %v778_v57, %v794_v9  ;;  %v796_v57 = vld [vmem:[%s1775_s24 + $0x40] sm:$0xff] }
  0xe1   : > { %1430 = vpow2.f32 %v506_v3  ;;  %v1423_v60 = vpop.eup %1422  ;;  %v532_v0 = vsel %vm417_vm0, %v1421_v1, 0.0  ;;  %v795_v1 = vld [vmem:[%s1775_s24 + $0x38] sm:$0xff] }
  0xe2   : > { %1432 = vpow2.f32 %v508_v53  ;;  %v541_v3 = vsel %vm417_vm0, %v1423_v60, 0.0 }
  0xe3   : > { %518 = vadd.xlane.f32.xlu0 %v517_v58  ;;  %524 = vadd.xlane.f32.xlu1 %v523_v61  ;;  %v825_v58 = vand.u32 2147483647, %v809_v10  ;;  %v510_v61 = vmul.f32 1.442695, %v480_v55  ;;  %v1425_v63 = vpop.eup %1424  ;;  %v779_v55 = vld [vmem:[%s1769_s14 + $0x38] sm:$0xff] }
  0xe4   : > { %v1427_v6 = vpop.eup %1426  ;;  %v538_v10 = vsel %vm417_vm0, %v1425_v63, 0.0 }
  0xe5   : > { %v857_v4 = vmul.f32 0.5, %v825_v58  ;;  %1434 = vpow2.f32 %v510_v61  ;;  %v544_v53 = vsel %vm417_vm0, %v1427_v6, 0.0  ;;  %v1290_v60 = vadd.f32 -0.5, %v825_v58 }
  0xe6   : > { %v1429_v51 = vpop.eup %1428  ;;  %v512_v61 = vmul.f32 1.442695, %v481_v32  ;;  %vm841_vm14 = vcmp.lt.f32.partialorder %v825_v58, 1.0 }
  0xe7   : > { %521 = vadd.xlane.f32.xlu0 %v520_v37  ;;  %530 = vadd.xlane.f32.xlu1 %v529_v50  ;;  %v632_v37 = vpop.permute.xlu1 %631  ;;  %v826_v50 = vand.u32 2147483647, %v810_v62  ;;  %v873_v9 = vmul.f32 %v857_v4, %v825_v58  ;;  %v547_v63 = vsel %vm417_vm0, %v1429_v51, 0.0  ;;  %v797_v4 = vld [vmem:[%s1775_s24 + $0x48] sm:$0xff] }
  0xe8   : > { %vm666_vm13 = vcmp.eq.s32.totalorder %v1837_v40, %v632_v37  ;;  %1436 = vpow2.f32 %v512_v61 }
  0xe9   : > { %v858_v62 = vmul.f32 0.5, %v826_v50  ;;  %v905_v37 = vsel %vm841_vm14, %v873_v9, %v1290_v60  ;;  %v1291_v32 = vadd.f32 -0.5, %v826_v50  ;;  %vm842_vm15 = vcmp.lt.f32.partialorder %v826_v50, 1.0  ;;  %v782_v9 = vld [vmem:[%s1769_s14 + $0x50] sm:$0xff] }
  0xea   : > { %v798_v60 = vld [vmem:[%s1775_s24 + $0x50] sm:$0xff] }
  0xeb   : > { %527 = vadd.xlane.f32.xlu0 %v526_v2  ;;  %536 = vadd.xlane.f32.xlu1 %v535_v54  ;;  %v1431_v2 = vpop.eup %1430  ;;  %v780_v54 = vld [vmem:[%s1769_s14 + $0x40] sm:$0xff]  ;;  %v874_v58 = vmul.f32 %v858_v62, %v826_v50 }
  0xec   : > { %v812_v6 = vsub.f32 %v780_v54, %v796_v57  ;;  %v1433_v33 = vpop.eup %1432  ;;  %v813_v57 = vsub.f32 %v781_v43, %v797_v4  ;;  %v814_v43 = vsub.f32 %v782_v9, %v798_v60  ;;  %v799_v4 = vld [vmem:[%s1775_s24 + $0x58] sm:$0xff] }
  0xed   : > { %v553_v51 = vsel %vm417_vm0, %v1433_v33, 0.0  ;;  %v906_v62 = vsel %vm842_vm15, %v874_v58, %v1291_v32 }
  0xef   : > { %533 = vadd.xlane.f32.xlu0 %v532_v0  ;;  %542 = vadd.xlane.f32.xlu1 %v541_v3  ;;  %v811_v0 = vsub.f32 %v779_v55, %v795_v1  ;;  %v550_v3 = vsel %vm417_vm0, %v1431_v2, 0.0  ;;  %v828_v2 = vand.u32 2147483647, %v812_v6  ;;  %v1435_v54 = vpop.eup %1434  ;;  %v935_v6 = vsel %vm916_vm2, %v906_v62, 0.0 }
  0xf0   : > { %v556_v33 = vsel %vm417_vm0, %v1435_v54, 0.0  ;;  %v641_v54 = vpop.permute.xlu0 %640 }
  0xf1   : > { %v827_v55 = vand.u32 2147483647, %v811_v0  ;;  %vm844_vm5 = vcmp.lt.f32.partialorder %v828_v2, 1.0  ;;  %vm669_vm6 = vcmp.eq.s32.totalorder %v1837_v40, %v641_v54 }
  0xf3   : > { %539 = vadd.xlane.f32.xlu0 %v538_v10  ;;  %545 = vadd.xlane.f32.xlu1 %v544_v53  ;;  %v635_v10 = vpop.permute.xlu1 %634  ;;  %v682_v53 = vsel %vm666_vm13, %v1680_v14, 0.0  ;;  %v932_v14 = vsel %vm916_vm2, %v905_v37, 0.0  ;;  %v859_v0 = vmul.f32 0.5, %v827_v55  ;;  %v783_v37 = vld [vmem:[%s1769_s14 + $0x58] sm:$0xff]  ;;  %vm843_vm4 = vcmp.lt.f32.partialorder %v827_v55, 1.0 }
  0xf4   : > { %v710_v1 = vsel %vm417_vm0, %v682_v53, 0.0  ;;  %vm667_vm1 = vcmp.eq.s32.totalorder %v1837_v40, %v635_v10  ;;  %v1292_v53 = vadd.f32 -0.5, %v827_v55  ;;  %v815_v9 = vsub.f32 %v783_v37, %v799_v4  ;;  %v785_v4 = vld [vmem:[%s1769_s14 + $0x68] sm:$0xff] }
  0xf5   : > { %v683_v50 = vsel %vm667_vm1, %v1677_v13, 0.0  ;;  %v875_v10 = vmul.f32 %v859_v0, %v827_v55 }
  0xf6   : > { %v713_v58 = vsel %vm417_vm0, %v683_v50, 0.0 }
  0xf7   : > { %548 = vadd.xlane.f32.xlu0 %v547_v63  ;;  %551 = vadd.xlane.f32.xlu1 %v550_v3  ;;  %v638_v61 = vpop.permute.xlu1 %637  ;;  %v860_v63 = vmul.f32 0.5, %v828_v2  ;;  %v829_v3 = vand.u32 2147483647, %v813_v57 }
  0xf8   : > { %vm668_vm3 = vcmp.eq.s32.totalorder %v1837_v40, %v638_v61  ;;  %v907_v61 = vsel %vm843_vm4, %v875_v10, %v1292_v53  ;;  %v831_v10 = vand.u32 2147483647, %v815_v9  ;;  %v647_v53 = vpop.permute.xlu0 %646 }
  0xf9   : > { %v876_v32 = vmul.f32 %v860_v63, %v828_v2  ;;  %v684_v13 = vsel %vm668_vm3, %v1690_v18, 0.0  ;;  %v861_v57 = vmul.f32 0.5, %v829_v3  ;;  %v800_v63 = vld [vmem:[%s1775_s24 + $0x60] sm:$0xff]  ;;  %v685_v18 = vsel %vm669_vm6, %v1687_v17, 0.0 }
  0xfa   : > { %v716_v62 = vsel %vm417_vm0, %v684_v13, 0.0  ;;  %v1294_v50 = vadd.f32 -0.5, %v829_v3  ;;  %vm845_vm8 = vcmp.lt.f32.partialorder %v829_v3, 1.0  ;;  %vm671_vm9 = vcmp.eq.s32.totalorder %v1837_v40, %v647_v53 }
  0xfb   : > { %554 = vadd.xlane.f32.xlu0 %v553_v51  ;;  %711 = vadd.xlane.f32.xlu1 %v710_v1  ;;  %v1293_v51 = vadd.f32 -0.5, %v828_v2  ;;  %v1437_v1 = vpop.eup %1436  ;;  %v644_v60 = vpop.permute.xlu1 %643  ;;  %v877_v2 = vmul.f32 %v861_v57, %v829_v3  ;;  %v863_v13 = vmul.f32 0.5, %v831_v10  ;;  %vm847_vm12 = vcmp.lt.f32.partialorder %v831_v10, 1.0 }
  0xfc   : > { %v559_v55 = vsel %vm417_vm0, %v1437_v1, 0.0  ;;  %vm670_vm7 = vcmp.eq.s32.totalorder %v1837_v40, %v644_v60  ;;  %vm402_vm6 = vcmp.gt.s32.totalorder %v1730_v34, 0 }
  0xfd   : > { %v908_v0 = vsel %vm844_vm5, %v876_v32, %v1293_v51  ;;  %v719_v32 = vsel %vm417_vm0, %v685_v18, 0.0  ;;  %v686_v17 = vsel %vm670_vm7, %v1700_v22, 0.0  ;;  %v909_v1 = vsel %vm845_vm8, %v877_v2, %v1294_v50 }
  0xfe   : > { %v941_v51 = vsel %vm916_vm2, %v908_v0, 0.0  ;;  %v787_v0 = vld [vmem:[%s1769_s14 + $0x78] sm:$0xff]  ;;  %v944_v22 = vsel %vm916_vm2, %v909_v1, 0.0  ;;  %v1296_v2 = vadd.f32 -0.5, %v831_v10  ;;  %vm997_vm7 = vcmask 7168  }
  0xff   : > { %933 = vadd.xlane.f32.xlu0 %v932_v14  ;;  %557 = vadd.xlane.f32.xlu1 %v556_v33  ;;  %v830_v14 = vand.u32 2147483647, %v814_v43  ;;  %v784_v33 = vld [vmem:[%s1769_s14 + $0x60] sm:$0xff]  ;;  %v650_v9 = vpop.permute.xlu1 %649  ;;  %vm401_vm8 = vcmp.gt.s32.totalorder %v1735_v36, 0 }
 0x100   : > { %v816_v37 = vsub.f32 %v784_v33, %v800_v63  ;;  %v803_v33 = vld [vmem:[%s1775_s24 + $0x78] sm:$0xff]  ;;  %v687_v63 = vsel %vm671_vm9, %v1697_v21, 0.0  ;;  %vm672_vm11 = vcmp.eq.s32.totalorder %v1837_v40, %v650_v9  ;;  %vm404_vm9 = vcmp.gt.s32.totalorder %v1738_v38, 0 }
 0x101   : > { %v862_v43 = vmul.f32 0.5, %v830_v14  ;;  %v1295_v3 = vadd.f32 -0.5, %v830_v14  ;;  %vm846_vm10 = vcmp.lt.f32.partialorder %v830_v14, 1.0 }
 0x102   : > { %v832_v60 = vand.u32 2147483647, %v816_v37  ;;  %v819_v37 = vsub.f32 %v787_v0, %v803_v33 }
 0x103   : > { %714 = vadd.xlane.f32.xlu0 %v713_v58  ;;  %936 = vadd.xlane.f32.xlu1 %v935_v6  ;;  %v938_v6 = vsel %vm916_vm2, %v907_v61, 0.0  ;;  %v801_v58 = vld [vmem:[%s1775_s24 + $0x68] sm:$0xff]  ;;  %v878_v54 = vmul.f32 %v862_v43, %v830_v14  ;;  %v786_v61 = vld [vmem:[%s1769_s14 + $0x70] sm:$0xff]  ;;  %v879_v14 = vmul.f32 %v863_v13, %v831_v10  ;;  %v653_v43 = vpop.permute.xlu0 %652 }
 0x104   : > { %v817_v57 = vsub.f32 %v785_v4, %v801_v58  ;;  %v725_v4 = vsel %vm417_vm0, %v687_v63, 0.0  ;;  %v688_v58 = vsel %vm672_vm11, %v1710_v26, 0.0  ;;  %vm673_vm13 = vcmp.eq.s32.totalorder %v1837_v40, %v653_v43 }
 0x105   : > { %v910_v18 = vsel %vm846_vm10, %v878_v54, %v1295_v3  ;;  %v1297_v54 = vadd.f32 -0.5, %v832_v60  ;;  %v835_v10 = vand.u32 2147483647, %v819_v37  ;;  %v728_v13 = vsel %vm417_vm0, %v688_v58, 0.0 }
 0x106   : > { %v833_v50 = vand.u32 2147483647, %v817_v57  ;;  %v947_v21 = vsel %vm916_vm2, %v910_v18, 0.0  ;;  %vm848_vm14 = vcmp.lt.f32.partialorder %v832_v60, 1.0  ;;  %v689_v57 = vsel %vm673_vm13, %v1707_v25, 0.0 }
 0x107   : > { %560 = vadd.xlane.f32.xlu0 %v559_v55  ;;  %717 = vadd.xlane.f32.xlu1 %v716_v62  ;;  %v722_v55 = vsel %vm417_vm0, %v686_v17, 0.0  ;;  %v802_v62 = vld [vmem:[%s1775_s24 + $0x70] sm:$0xff]  ;;  %v656_v17 = vpop.permute.xlu1 %655  ;;  %v867_v33 = vmul.f32 0.5, %v835_v10  ;;  %v1300_v43 = vadd.f32 -0.5, %v835_v10  ;;  %vm851_vm5 = vcmp.lt.f32.partialorder %v835_v10, 1.0 }
 0x108   : > { %v818_v53 = vsub.f32 %v786_v61, %v802_v62  ;;  %vm674_vm15 = vcmp.eq.s32.totalorder %v1837_v40, %v656_v17  ;;  %v1298_v61 = vadd.f32 -0.5, %v833_v50  ;;  %vm849_vm1 = vcmp.lt.f32.partialorder %v833_v50, 1.0 }
 0x109   : > { %vm406_vm10 = vcmp.gt.s32.totalorder %v1750_v44, 0  ;;  %vm407_vm11 = vcmp.gt.s32.totalorder %v1756_v46, 0  ;;  %vm409_vm13 = vcmp.gt.s32.totalorder %v1778_v49, 0 }
 0x10a   : > { %v834_v3 = vand.u32 2147483647, %v818_v53 }
 0x10b   : > { %939 = vadd.xlane.f32.xlu0 %v938_v6  ;;  %720 = vadd.xlane.f32.xlu1 %v719_v32  ;;  %v864_v6 = vmul.f32 0.5, %v832_v60  ;;  %v911_v32 = vsel %vm847_vm12, %v879_v14, %v1296_v2  ;;  %v883_v2 = vmul.f32 %v867_v33, %v835_v10  ;;  %vm408_vm12 = vcmp.gt.s32.totalorder %v1762_v48, 0 }
 0x10c   : > { %v950_v26 = vsel %vm916_vm2, %v911_v32, 0.0  ;;  %v866_v0 = vmul.f32 0.5, %v834_v3  ;;  %v1299_v14 = vadd.f32 -0.5, %v834_v3  ;;  %vm850_vm4 = vcmp.lt.f32.partialorder %v834_v3, 1.0 }
 0x10d   : > { %v880_v1 = vmul.f32 %v864_v6, %v832_v60  ;;  %v690_v60 = vsel %vm674_vm15, %v1720_v30, 0.0  ;;  %vm411_vm15 = vcmp.gt.s32.totalorder %v1783_v52, 0 }
 0x10e   : > { %v882_v18 = vmul.f32 %v866_v0, %v834_v3  ;;  %v734_v6 = vsel %vm417_vm0, %v690_v60, 0.0 }
 0x10f   : > { %942 = vadd.xlane.f32.xlu0 %v941_v51  ;;  %723 = vadd.xlane.f32.xlu1 %v722_v55  ;;  %v865_v51 = vmul.f32 0.5, %v833_v50  ;;  %v659_v55 = vpop.permute.xlu0 %658  ;;  %v912_v62 = vsel %vm848_vm14, %v880_v1, %v1297_v54  ;;  %vm410_vm14 = vcmp.gt.s32.totalorder %v1741_v39, 0 }
 0x110   : > { %vm675_vm3 = vcmp.eq.s32.totalorder %v1837_v40, %v659_v55  ;;  %v953_v25 = vsel %vm916_vm2, %v912_v62, 0.0  ;;  %v914_v37 = vsel %vm850_vm4, %v882_v18, %v1299_v14  ;;  %v1551_v14 = vmov 0.0  }
 0x111   : > { %v881_v9 = vmul.f32 %v865_v51, %v833_v50  ;;  %v691_v50 = vsel %vm675_vm3, %v1717_v29, 0.0  ;;  %v959_v32 = vsel %vm916_vm2, %v914_v37, 0.0  ;;  %vm387_vm3 = vcmp.ge.s32.totalorder %v1733_v35, 0 }
 0x112   : > { %vm385_vm4 = vcmp.ge.s32.totalorder %v1735_v36, 0 }
 0x113   : > { %945 = vadd.xlane.f32.xlu0 %v944_v22  ;;  %726 = vadd.xlane.f32.xlu1 %v725_v4  ;;  %v731_v22 = vsel %vm417_vm0, %v689_v57, 0.0  ;;  %v913_v63 = vsel %vm849_vm1, %v881_v9, %v1298_v61  ;;  %v922_v53 = vpop.xlane.xlu0 %921  ;;  %v915_v4 = vsel %vm851_vm5, %v883_v2, %v1300_v43  ;;  %v982_v2 = vsel %vm402_vm6, 1.0, %v1551_v14 }
 0x114   : > { %v956_v30 = vsel %vm916_vm2, %v913_v63, 0.0  ;;  %v966_v58 = vsel %vm402_vm6, %v922_v53, 0.0  ;;  %v962_v51 = vsel %vm916_vm2, %v915_v4, 0.0  ;;  %vm405_vm2 = vcmp.gt.s32.totalorder %v1744_v41, 0 }
 0x115   : > { %v999_v29 = vsel %vm997_vm7, %v966_v58, 0.0  ;;  %v981_v43 = vsel %vm401_vm8, 1.0, %v1551_v14  ;;  %vm386_vm1 = vcmp.ge.s32.totalorder %v1730_v34, 0  ;;  %vm412_vm5 = vcmp.gt.s32.totalorder %v1747_v42, 0 }
 0x116   : > { %vm388_vm6 = vcmp.ge.s32.totalorder %v1738_v38, 0 }
 0x117   : > { %948 = vadd.xlane.f32.xlu0 %v947_v21  ;;  %729 = vadd.xlane.f32.xlu1 %v728_v13  ;;  %v737_v21 = vsel %vm417_vm0, %v691_v50, 0.0  ;;  %v928_v3 = vpop.xlane.xlu0 %927  ;;  %vm403_vm0 = vcmp.gt.s32.totalorder %v1733_v35, 0  ;;  %v1072_v50 = vsel %vm997_vm7, %v981_v43, 0.0  ;;  %v988_v43 = vsel %vm408_vm12, 1.0, %v1551_v14 }
 0x118   : > { %v968_v13 = vsel %vm404_vm9, %v928_v3, 0.0 }
 0x119   : > { %v1003_v9 = vsel %vm997_vm7, %v968_v13, 0.0 }
 0x11b   : > { %951 = vadd.xlane.f32.xlu0 %v950_v26  ;;  %732 = vadd.xlane.f32.xlu1 %v731_v22 }
 0x11f   : > { %954 = vadd.xlane.f32.xlu0 %v953_v25  ;;  %735 = vadd.xlane.f32.xlu1 %v734_v6  ;;  %v1073_v6 = vsel %vm997_vm7, %v982_v2, 0.0 }
 0x120   : > { %v1074_v4 = vadd.f32 %v1073_v6, %v1072_v50 }
 0x123   : > { %957 = vadd.xlane.f32.xlu0 %v956_v30  ;;  %738 = vadd.xlane.f32.xlu1 %v737_v21  ;;  %v983_v30 = vsel %vm403_vm0, 1.0, %v1551_v14  ;;  %v984_v21 = vsel %vm404_vm9, 1.0, %v1551_v14  ;;  %vm389_vm9 = vcmp.ge.s32.totalorder %v1744_v41, 0 }
 0x124   : > { %v919_v17 = vpop.xlane.xlu1 %918  ;;  %v1075_v58 = vsel %vm997_vm7, %v983_v30, 0.0 }
 0x125   : > { %v965_v1 = vsel %vm401_vm8, %v919_v17, 0.0  ;;  %v1077_v17 = vsel %vm997_vm7, %v984_v21, 0.0  ;;  %vm413_vm8 = vcmp.gt.s32.totalorder %v1788_v56, 0 }
 0x126   : > { %v998_v54 = vsel %vm997_vm7, %v965_v1, 0.0  ;;  %v985_v1 = vsel %vm405_vm2, 1.0, %v1551_v14 }
 0x127   : > { %960 = vadd.xlane.f32.xlu0 %v959_v32  ;;  %963 = vadd.xlane.f32.xlu1 %v962_v51  ;;  %v1000_v10 = vadd.f32 %v999_v29, %v998_v54  ;;  %v1076_v29 = vadd.f32 %v1075_v58, %v1074_v4  ;;  %v1079_v13 = vsel %vm997_vm7, %v985_v1, 0.0 }
 0x128   : > { %v925_v57 = vpop.xlane.xlu1 %924 }
 0x129   : > { %v967_v26 = vsel %vm403_vm0, %v925_v57, 0.0  ;;  %v986_v57 = vsel %vm406_vm10, 1.0, %v1551_v14  ;;  %vm2263_vm0 = vcmp.gt.s32.totalorder %v1753_v45, 0 }
 0x12a   : > { %v1001_v61 = vsel %vm997_vm7, %v967_v26, 0.0 }
 0x12b   : > { %v1002_v55 = vadd.f32 %v1001_v61, %v1000_v10  ;;  %v1078_v10 = vadd.f32 %v1077_v17, %v1076_v29  ;;  %v989_v29 = vsel %vm409_vm13, 1.0, %v1551_v14 }
 0x12c   : > { %v931_v62 = vpop.xlane.xlu1 %930 }
 0x12d   : > { %v969_v0 = vsel %vm405_vm2, %v931_v62, 0.0  ;;  %v1004_v33 = vadd.f32 %v1003_v9, %v1002_v55  ;;  %v1080_v61 = vadd.f32 %v1079_v13, %v1078_v10  ;;  %v1081_v55 = vsel %vm997_vm7, %v986_v57, 0.0 }
 0x12e   : > { %v1005_v22 = vsel %vm997_vm7, %v969_v0, 0.0  ;;  %v987_v62 = vsel %vm407_vm11, 1.0, %v1551_v14  ;;  %vm2264_vm2 = vcmp.gt.s32.totalorder %v1791_v59, 0 }
 0x12f   : > { %v1988_v60 = vadd.f32 %v1005_v22, %v1004_v33  ;;  %v1082_v22 = vadd.f32 %v1081_v55, %v1080_v61  ;;  %v1083_v2 = vsel %vm997_vm7, %v987_v62, 0.0  ;;  %v990_v55 = vsel %vm410_vm14, 1.0, %v1551_v14 }
 0x131   : > { %v1084_v58 = vadd.f32 %v1083_v2, %v1082_v22 }
 0x15c   : > { %v1990_v25 = vpop.xlane.xlu0 %696 }
 0x160   : > { %v1992_v63 = vpop.xlane.xlu0 %699  ;;  %v1994_v18 = vpop.xlane.xlu1 %693 }
 0x164   : > { %v2007_v53 = vpop.xlane.xlu0 %702 }
 0x168   : > { %v2009_v37 = vpop.xlane.xlu1 %705 }
 0x16c   : > { %v516_v32 = vpop.xlane.xlu1 %515  ;;  %v2015_v51 = vpop.xlane.xlu0 %708 }
 0x170   : > { %v525_v54 = vpop.xlane.xlu1 %524  ;;  %v519_v3 = vpop.xlane.xlu0 %518 }
 0x171   : > { %1438 = vlog2.f32 %v519_v3 }
 0x172   : > { %1440 = vlog2.f32 %v516_v32  ;;  %v1085_v32 = vsel %vm997_vm7, %v988_v43, 0.0 }
 0x173   : > { %v1086_v13 = vadd.f32 %v1085_v32, %v1084_v58 }
 0x174   : > { %v531_v26 = vpop.xlane.xlu1 %530  ;;  %v522_v9 = vpop.xlane.xlu0 %521 }
 0x175   : > { %1442 = vlog2.f32 %v522_v9  ;;  %v1087_v9 = vsel %vm997_vm7, %v989_v29, 0.0 }
 0x176   : > { %1444 = vlog2.f32 %v525_v54  ;;  %v1088_v43 = vadd.f32 %v1087_v9, %v1086_v13 }
 0x178   : > { %v537_v0 = vpop.xlane.xlu1 %536  ;;  %v528_v33 = vpop.xlane.xlu0 %527 }
 0x179   : > { %1446 = vlog2.f32 %v528_v33 }
 0x17a   : > { %1448 = vlog2.f32 %v531_v26 }
 0x17b   : > { %v1439_v6 = vpop.eup %1438 }
 0x17c   : > { %v543_v50 = vpop.xlane.xlu1 %542  ;;  %v534_v30 = vpop.xlane.xlu0 %533  ;;  %v565_v21 = vmul.f32 0.6931472, %v1439_v6 }
 0x17d   : > { %v1441_v4 = vpop.eup %1440  ;;  %1450 = vlog2.f32 %v534_v30  ;;  %v991_v30 = vsel %vm411_vm15, 1.0, %v1551_v14 }
 0x17e   : > { %v563_v1 = vmul.f32 0.6931472, %v1441_v4  ;;  %v595_v57 = vadd.f32 %v565_v21, %v1811_v11  ;;  %v1089_v4 = vsel %vm997_vm7, %v990_v55, 0.0  ;;  %1452 = vlog2.f32 %v537_v0 }
 0x17f   : > { %v1443_v17 = vpop.eup %1442 }
 0x180   : > { %v546_v54 = vpop.xlane.xlu1 %545  ;;  %v540_v3 = vpop.xlane.xlu0 %539  ;;  %v567_v10 = vmul.f32 0.6931472, %v1443_v17  ;;  %v594_v62 = vadd.f32 %v563_v1, %v1807_v7  ;;  %v741_v11 = vsub.f32 %v595_v57, %v1990_v25  ;;  %v1090_v25 = vadd.f32 %v1089_v4, %v1088_v43 }
 0x181   : > { %v1445_v61 = vpop.eup %1444  ;;  %1454 = vlog2.f32 %v540_v3 }
 0x182   : > { %v596_v33 = vadd.f32 %v567_v10, %v1805_v5  ;;  %v569_v6 = vmul.f32 0.6931472, %v1445_v61  ;;  %v740_v7 = vsub.f32 %v594_v62, %v1994_v18  ;;  %v757_v29 = vsel %vm386_vm1, %v741_v11, 0.0 }
 0x183   : > { %v1447_v2 = vpop.eup %1446  ;;  %v1091_v18 = vsel %vm997_vm7, %v991_v30, 0.0  ;;  %1456 = vlog2.f32 %v543_v50  ;;  %v1036_v3 = vsel %vm997_vm7, %v757_v29, 0.0  ;;  %vm390_vm1 = vcmp.ge.s32.totalorder %v1750_v44, 0 }
 0x184   : > { %v552_v22 = vpop.xlane.xlu1 %551  ;;  %v549_v26 = vpop.xlane.xlu0 %548  ;;  %v742_v5 = vsub.f32 %v596_v33, %v1992_v63  ;;  %v571_v58 = vmul.f32 0.6931472, %v1447_v2  ;;  %v597_v34 = vadd.f32 %v569_v6, %v1809_v8  ;;  %v992_v63 = vsel %vm412_vm5, 1.0, %v1551_v14 }
 0x185   : > { %v1449_v17 = vpop.eup %1448  ;;  %v756_v0 = vsel %vm385_vm4, %v740_v7, 0.0  ;;  %1458 = vlog2.f32 %v546_v54  ;;  %v1092_v9 = vadd.f32 %v1091_v18, %v1090_v25  ;;  %vm392_vm4 = vcmp.ge.s32.totalorder %v1762_v48, 0 }
 0x186   : > { %v758_v1 = vsel %vm387_vm3, %v742_v5, 0.0  ;;  %v598_v35 = vadd.f32 %v571_v58, %v1815_v15  ;;  %v743_v13 = vsub.f32 %v597_v34, %v2007_v53  ;;  %v573_v57 = vmul.f32 0.6931472, %v1449_v17 }
 0x187   : > { %v1451_v8 = vpop.eup %1450  ;;  %v1035_v61 = vsel %vm997_vm7, %v756_v0, 0.0  ;;  %v1038_v55 = vsel %vm997_vm7, %v758_v1, 0.0  ;;  %v1093_v15 = vsel %vm997_vm7, %v992_v63, 0.0  ;;  %1460 = vlog2.f32 %v549_v26 }
 0x188   : > { %v2058_v21 = vpop.xlane.xlu1 %711  ;;  %v555_v32 = vpop.xlane.xlu0 %554  ;;  %v1037_v50 = vadd.f32 %v1036_v3, %v1035_v61  ;;  %v744_v62 = vsub.f32 %v598_v35, %v2009_v37  ;;  %v575_v33 = vmul.f32 0.6931472, %v1451_v8  ;;  %v993_v53 = vsel %vm413_vm8, 1.0, %v1551_v14 }
 0x189   : > { %v1453_v43 = vpop.eup %1452  ;;  %v759_v6 = vsel %vm388_vm6, %v743_v13, 0.0  ;;  %v599_v11 = vadd.f32 %v573_v57, %v1813_v12  ;;  %1462 = vlog2.f32 %v552_v22  ;;  %v1094_v37 = vadd.f32 %v1093_v15, %v1092_v9 }
 0x18a   : > { %v1039_v4 = vadd.f32 %v1038_v55, %v1037_v50  ;;  %v760_v30 = vsel %vm389_vm9, %v744_v62, 0.0  ;;  %v600_v7 = vadd.f32 %v575_v33, %v1819_v19  ;;  %v1095_v58 = vsel %vm997_vm7, %v993_v53, 0.0 }
 0x18b   : > { %v1455_v26 = vpop.eup %1454  ;;  %v1040_v25 = vsel %vm997_vm7, %v759_v6, 0.0  ;;  %v577_v38 = vmul.f32 0.6931472, %v1453_v43  ;;  %1464 = vlog2.f32 %v555_v32  ;;  %v994_v12 = vsel %vm2263_vm0, 1.0, %v1551_v14 }
 0x18c   : > { %v558_v36 = vpop.xlane.xlu1 %557  ;;  %v2069_v10 = vpop.xlane.xlu0 %933  ;;  %v745_v34 = vsub.f32 %v599_v11, %v2015_v51  ;;  %v1041_v29 = vadd.f32 %v1040_v25, %v1039_v4  ;;  %v579_v17 = vmul.f32 0.6931472, %v1455_v26  ;;  %vm391_vm3 = vcmp.ge.s32.totalorder %v1756_v46, 0 }
 0x18d   : > { %v1457_v22 = vpop.eup %1456  ;;  %v1042_v18 = vsel %vm997_vm7, %v760_v30, 0.0  ;;  %v746_v32 = vsub.f32 %v600_v7, %v2058_v21  ;;  %v1096_v1 = vadd.f32 %v1095_v58, %v1094_v37  ;;  %v1097_v51 = vsel %vm997_vm7, %v994_v12, 0.0 }
 0x18e   : > { %v581_v35 = vmul.f32 0.6931472, %v1457_v22  ;;  %1466 = vlog2.f32 %v558_v36  ;;  %v601_v8 = vadd.f32 %v577_v38, %v1817_v16  ;;  %v995_v3 = vsel %vm2264_vm2, 1.0, %v1551_v14 }
 0x18f   : > { %v1459_v19 = vpop.eup %1458  ;;  %v761_v21 = vsel %vm390_vm1, %v745_v34, 0.0  ;;  %v1043_v9 = vadd.f32 %v1042_v18, %v1041_v29  ;;  %vm393_vm6 = vcmp.ge.s32.totalorder %v1778_v49, 0  ;;  %v602_v55 = vadd.f32 %v579_v17, %v1823_v23 }
 0x190   : > { %v2079_v54 = vpop.xlane.xlu1 %936  ;;  %v2081_v2 = vpop.xlane.xlu0 %714  ;;  %v583_v57 = vmul.f32 0.6931472, %v1459_v19  ;;  %vm394_vm9 = vcmp.ge.s32.totalorder %v1741_v39, 0  ;;  %vm395_vm0 = vcmp.ge.s32.totalorder %v1783_v52, 0  ;;  %v762_v36 = vsel %vm391_vm3, %v746_v32, 0.0 }
 0x191   : > { %v1461_v13 = vpop.eup %1460  ;;  %v747_v61 = vsub.f32 %v601_v8, %v2081_v2  ;;  %vm396_vm2 = vcmp.ge.s32.totalorder %v1747_v42, 0  ;;  %v1098_v62 = vadd.f32 %v1097_v51, %v1096_v1  ;;  %v1099_v33 = vsel %vm997_vm7, %v995_v3, 0.0 }
 0x192   : > { %vm416_vm1 = vcmp.gt.s32.totalorder %v1759_v47, 0  ;;  %v585_v2 = vmul.f32 0.6931472, %v1461_v13  ;;  %v1044_v23 = vsel %vm997_vm7, %v761_v21, 0.0  ;;  %v603_v43 = vadd.f32 %v581_v35, %v1821_v20 }
 0x193   : > { %v1463_v16 = vpop.eup %1462  ;;  %v1045_v6 = vadd.f32 %v1044_v23, %v1043_v9  ;;  %v970_v11 = vsel %vm406_vm10, %v2069_v10, 0.0  ;;  %v604_v4 = vadd.f32 %v583_v57, %v1827_v27  ;;  %v1046_v30 = vsel %vm997_vm7, %v762_v36, 0.0 }
 0x194   : > { %v2091_v5 = vpop.xlane.xlu1 %717  ;;  %v561_v41 = vpop.xlane.xlu0 %560  ;;  %v587_v26 = vmul.f32 0.6931472, %v1463_v16  ;;  %v763_v7 = vsel %vm392_vm4, %v747_v61, 0.0  ;;  %v971_v20 = vsel %vm407_vm11, %v2079_v54, 0.0  ;;  %vm397_vm3 = vcmp.ge.s32.totalorder %v1788_v56, 0 }
 0x195   : > { %v748_v53 = vsub.f32 %v602_v55, %v2091_v5  ;;  %1468 = vlog2.f32 %v561_v41  ;;  %v1465_v37 = vpop.eup %1464  ;;  %v1100_v44 = vadd.f32 %v1099_v33, %v1098_v62  ;;  %v996_v27 = vsel %vm416_vm1, 1.0, %v1551_v14 }
 0x196   : > { %v1007_v10 = vsel %vm997_vm7, %v970_v11, 0.0  ;;  %v605_v12 = vadd.f32 %v585_v2, %v1825_v24  ;;  %v1047_v22 = vadd.f32 %v1046_v30, %v1045_v6  ;;  %v589_v46 = vmul.f32 0.6931472, %v1465_v37  ;;  %v2269_v11 = vld [vmem:[#allocation6_spill] sm:$0xff] }
 0x197   : > { %v764_v41 = vsel %vm393_vm6, %v748_v53, 0.0  ;;  %v1048_v54 = vsel %vm997_vm7, %v763_v7, 0.0  ;;  %v1009_v19 = vsel %vm997_vm7, %v971_v20, 0.0  ;;  %v606_v32 = vadd.f32 %v587_v26, %v1831_v31 }
 0x198   : > { %v721_v63 = vpop.xlane.xlu1 %720  ;;  %v940_v0 = vpop.xlane.xlu0 %939  ;;  %v1050_v24 = vsel %vm997_vm7, %v764_v41, 0.0  ;;  %v1101_v48 = vsel %vm997_vm7, %v996_v27, 0.0  ;;  %v607_v21 = vadd.f32 %v589_v46, %v1829_v28  ;;  %vm398_vm10 = vcmp.ge.s32.totalorder %v1753_v45, 0 }
 0x199   : > { %v749_v58 = vsub.f32 %v603_v43, %v721_v63  ;;  %v972_v34 = vsel %vm408_vm12, %v940_v0, 0.0  ;;  %v1467_v29 = vpop.eup %1466  ;;  %v1008_v63 = vadd.f32 %v1007_v10, %v1988_v60  ;;  %v1049_v0 = vadd.f32 %v1048_v54, %v1047_v22  ;;  %v2270_v54 = vld [vmem:[#allocation5_spill] sm:$0xff] }
 0x19a   : > { %v1011_v8 = vsel %vm997_vm7, %v972_v34, 0.0  ;;  %v591_v57 = vmul.f32 0.6931472, %v1467_v29  ;;  %v1102_v33 = vadd.f32 %v1101_v48, %v1100_v44  ;;  %vm399_vm11 = vcmp.ge.s32.totalorder %v1791_v59, 0 }
 0x19b   : > { %v765_v17 = vsel %vm394_vm9, %v749_v58, 0.0  ;;  %v1010_v31 = vadd.f32 %v1009_v19, %v1008_v63  ;;  %v1051_v9 = vadd.f32 %v1050_v24, %v1049_v0  ;;  %vm400_vm12 = vcmp.ge.s32.totalorder %v1759_v47, 0 }
 0x19c   : > { %v724_v15 = vpop.xlane.xlu1 %723  ;;  %v943_v50 = vpop.xlane.xlu0 %942  ;;  %v1052_v60 = vsel %vm997_vm7, %v765_v17, 0.0  ;;  %v1103_v42 = vrot.slane %v1102_v33, 4 }
 0x19d   : > { %v750_v38 = vsub.f32 %v604_v4, %v724_v15  ;;  %v973_v1 = vsel %vm409_vm13, %v943_v50, 0.0  ;;  %v1012_v36 = vadd.f32 %v1011_v8, %v1010_v31  ;;  %v1053_v2 = vadd.f32 %v1052_v60, %v1051_v9 }
 0x19e   : > { %v1013_v49 = vsel %vm997_vm7, %v973_v1, 0.0  ;;  %v608_v4 = vadd.f32 %v591_v57, %v2269_v11  ;;  %vm2271_vm13 = vcmp.gt.s32.totalorder %v1753_v45, 0  ;;  %v1104_v0 = vadd.f32 %v1103_v42, %v1102_v33 }
 0x19f   : > { %v766_v3 = vsel %vm395_vm0, %v750_v38, 0.0  ;;  %v1469_v16 = vpop.eup %1468  ;;  %v1014_v43 = vadd.f32 %v1013_v49, %v1012_v36 }
 0x1a0   : > { %v727_v5 = vpop.xlane.xlu1 %726  ;;  %v946_v25 = vpop.xlane.xlu0 %945  ;;  %v1054_v15 = vsel %vm997_vm7, %v766_v3, 0.0  ;;  %v593_v37 = vmul.f32 0.6931472, %v1469_v16 }
 0x1a1   : > { %v751_v18 = vsub.f32 %v605_v12, %v727_v5  ;;  %v974_v55 = vsel %vm410_vm14, %v946_v25, 0.0  ;;  %v1055_v26 = vadd.f32 %v1054_v15, %v1053_v2  ;;  %vm2272_vm14 = vcmp.gt.s32.totalorder %v1791_v59, 0 }
 0x1a2   : > { %v1015_v6 = vsel %vm997_vm7, %v974_v55, 0.0  ;;  %v609_v34 = vadd.f32 %v593_v37, %v2270_v54  ;;  %v1105_v55 = vrot.slane %v1104_v0, 2 }
 0x1a3   : > { %v767_v61 = vsel %vm396_vm2, %v751_v18, 0.0  ;;  %v1016_v44 = vadd.f32 %v1015_v6, %v1014_v43 }
 0x1a4   : > { %v730_v51 = vpop.xlane.xlu1 %729  ;;  %v949_v35 = vpop.xlane.xlu0 %948  ;;  %v1056_v39 = vsel %vm997_vm7, %v767_v61, 0.0 }
 0x1a5   : > { %v752_v13 = vsub.f32 %v606_v32, %v730_v51  ;;  %v975_v23 = vsel %vm411_vm15, %v949_v35, 0.0  ;;  %v1057_v25 = vadd.f32 %v1056_v39, %v1055_v26  ;;  %vm1116_vm15 = vcmp.eq.s32.totalorder %v1837_v40, 1 }
 0x1a6   : > { %v1017_v20 = vsel %vm997_vm7, %v975_v23, 0.0 }
 0x1a7   : > { %v768_v28 = vsel %vm397_vm3, %v752_v13, 0.0  ;;  %v1018_v22 = vadd.f32 %v1017_v20, %v1016_v44 }
 0x1a8   : > { %v733_v50 = vpop.xlane.xlu1 %732  ;;  %v952_v62 = vpop.xlane.xlu0 %951  ;;  %v1058_v58 = vsel %vm997_vm7, %v768_v28, 0.0 }
 0x1a9   : > { %v753_v53 = vsub.f32 %v607_v21, %v733_v50  ;;  %v976_v7 = vsel %vm412_vm5, %v952_v62, 0.0  ;;  %v1059_v12 = vadd.f32 %v1058_v58, %v1057_v25  ;;  %v1106_v62 = vadd.f32 %v1105_v55, %v1104_v0 }
 0x1aa   : > { %v1019_v38 = vsel %vm997_vm7, %v976_v7, 0.0  ;;  %vm1109_vm5 = vcmp.eq.s32.totalorder %v1837_v40, 0 }
 0x1ab   : > { %v769_v30 = vsel %vm398_vm10, %v753_v53, 0.0  ;;  %v1020_v32 = vadd.f32 %v1019_v38, %v1018_v22  ;;  %v1107_v23 = vrot.slane %v1106_v62, 1 }
 0x1ac   : > { %v736_v52 = vpop.xlane.xlu1 %735  ;;  %v955_v5 = vpop.xlane.xlu0 %954  ;;  %v1060_v41 = vsel %vm997_vm7, %v769_v30, 0.0 }
 0x1ad   : > { %v754_v27 = vsub.f32 %v608_v4, %v736_v52  ;;  %v977_v10 = vsel %vm413_vm8, %v955_v5, 0.0  ;;  %v1061_v56 = vadd.f32 %v1060_v41, %v1059_v12  ;;  %v1108_v43 = vadd.f32 %v1107_v23, %v1106_v62 }
 0x1ae   : > { %v1021_v19 = vsel %vm997_vm7, %v977_v10, 0.0  ;;  %vm1124_vm8 = vcmp.eq.s32.totalorder %v1837_v40, 2 }
 0x1af   : > { %v770_v46 = vsel %vm399_vm11, %v754_v27, 0.0  ;;  %v1022_v35 = vadd.f32 %v1021_v19, %v1020_v32 }
 0x1b0   : > { %v1062_v29 = vsel %vm997_vm7, %v770_v46, 0.0  ;;  %v739_v17 = vpop.xlane.xlu1 %738  ;;  %v958_v18 = vpop.xlane.xlu0 %957 }
 0x1b1   : > { %v755_v63 = vsub.f32 %v609_v34, %v739_v17  ;;  %v978_v24 = vsel %vm2271_vm13, %v958_v18, 0.0  ;;  %v1063_v51 = vadd.f32 %v1062_v29, %v1061_v56 }
 0x1b2   : > { %v1023_v1 = vsel %vm997_vm7, %v978_v24, 0.0 }
 0x1b3   : > { %v771_v48 = vsel %vm400_vm12, %v755_v63, 0.0  ;;  %v1024_v31 = vadd.f32 %v1023_v1, %v1022_v35 }
 0x1b4   : > { %v1064_v8 = vsel %vm997_vm7, %v771_v48, 0.0  ;;  %v961_v3 = vpop.xlane.xlu0 %960  ;;  %v964_v13 = vpop.xlane.xlu1 %963 }
 0x1b5   : > { %v1065_v57 = vadd.f32 %v1064_v8, %v1063_v51  ;;  %v979_v60 = vsel %vm2272_vm14, %v961_v3, 0.0  ;;  %v980_v21 = vsel %vm416_vm1, %v964_v13, 0.0 }
 0x1b6   : > { %v1025_v45 = vsel %vm997_vm7, %v979_v60, 0.0  ;;  %v1027_v9 = vsel %vm997_vm7, %v980_v21, 0.0  ;;  %vm335_vm7 = vcmask 16384  }
 0x1b7   : > { %v1066_v49 = vrot.slane %v1065_v57, 4  ;;  %v1026_v61 = vadd.f32 %v1025_v45, %v1024_v31  ;;  %336 = vst.msk [vmem:[%s290_s29] sm:$0x1] %vm335_vm7, %v1551_v14 }
 0x1b9   : > { %v1067_v16 = vadd.f32 %v1066_v49, %v1065_v57  ;;  %v1028_v36 = vadd.f32 %v1027_v9, %v1026_v61 }
 0x1bb   : > { %v1029_v15 = vrot.slane %v1028_v36, 4  ;;  %v1068_v50 = vrot.slane %v1067_v16, 2 }
 0x1bd   : > { %v1030_v33 = vadd.f32 %v1029_v15, %v1028_v36  ;;  %v1069_v2 = vadd.f32 %v1068_v50, %v1067_v16 }
 0x1be   : > { %v1132_v20 = vld [vmem:[%s290_s29] sm:$0x1] }
 0x1bf   : > { %v1031_v59 = vrot.slane %v1030_v33, 2  ;;  %v1070_v28 = vrot.slane %v1069_v2, 1 }
 0x1c1   : > { %v1071_v47 = vadd.f32 %v1070_v28, %v1069_v2  ;;  %v1032_v53 = vadd.f32 %v1031_v59, %v1030_v33 }
 0x1c3   : > { %1119 = vperm.xlu1 %1405, %v1071_v47   ;;  %v1033_v39 = vrot.slane %v1032_v53, 1 }
 0x1c5   : > { %v1034_v6 = vadd.f32 %v1033_v39, %v1032_v53 }
 0x1c7   : > { %1127 = vperm.xlu1 %1405, %v1108_v43   ;;  %1112 = vperm.xlu0 %1404, %v1034_v6  }
 0x242   : > { %v1120_v11 = vpop.permute.xlu1 %1119 }
 0x243   : > { %v1122_v26 = vsel %vm1116_vm15, %v1120_v11, 0.0 }
 0x246   : > { %v1128_v4 = vpop.permute.xlu1 %1127  ;;  %v1113_v37 = vpop.permute.xlu0 %1112 }
 0x247   : > { %v1115_v30 = vsel %vm1109_vm5, %v1113_v37, 0.0  ;;  %v1130_v58 = vsel %vm1124_vm8, %v1128_v4, 0.0 }
 0x248   : > { %v1123_v7 = vadd.f32 %v1122_v26, %v1115_v30 }
 0x24a   : > { %v1131_v14 = vadd.f32 %v1130_v58, %v1123_v7 }
 0x24c   : > { %v1133_v52 = vadd.f32 %v1132_v20, %v1131_v14 }
 0x24e   : > { %1135 = vst.msk [vmem:[%s290_s29] sm:$0x1] %vm335_vm7, %v1133_v52 }
 0x24f   : > { %1483 = shalt.err (!%p1480_p5)
}
 0x250   : > { %s1484_s13 = scalar_lea.hbm %s2208_s8, 16  ;;  %s1488_s22 = scalar_lea.hbm %s2260_s4, 32 }
 0x251   : > { %p1485_p6 = scmp.ne.s32.totalorder %s2208_s8, %s1484_s13  ;;  %p1489_p10 = scmp.lt.u32.totalorder %s2208_s8, %s2260_s4 }
 0x252   : > { %p1490_p11 = scmp.lt.u32.totalorder %s1488_s22, %s1484_s13  ;;  %p1492_p13 = scmp.lt.u32.totalorder %s1484_s13, %s2208_s8 }
 0x253   : > { %p1486_p7 = pnand %p1485_p6, %p1618_p4 }
 0x254   : > { %p1491_p12 = por %p1490_p11, %p1489_p10 }
 0x255   : > { %p1487_p9 = pneg %p1486_p7 }
 0x256   : > { %p1493_p0 = por %p1492_p13, %p1491_p12 }
 0x258   : > { %p1494_p1 = pnand %p1493_p0, %p1487_p9 }
 0x25a   : > { %1497 = shalt.err (!%p1494_p1)
}
 0x25b   : > { %1347 = dma.vmem_to_hbm [thread:$0]  (%p1618_p4), %s2210_s5, 16, %s2208_s8, %s1137_s9  }
 0x25c PF: > { %p1353_p2 = scmp.ge.s32.totalorder %s1548_s20, 2  ;;  %s1161_s29 = sand.u32 1, %s1528_s15  }
 0x25d   : > { %s1162_s30 = scalar_lea.sflag [#allocation3], %s1161_s29 }
 0x25e   : > { %p1350_p3 = pnand %p1353_p2, %p1625_p8 }
 0x260   : > { %1523 = dma.done.wait (!%p1350_p3), %s1162_s30, 16  }
 0x261   : > { %1525 = vsyncadd (!%p1350_p3), %s1162_s30, 4294967280  ;;  %s17_s20 = sadd.s32 1, %s1548_s20   ;;  %s2273_s15 = smov %s1532_s16 }
 0x262   : > { %p14_p5 = scmp.ge.s32.totalorder %s17_s20, 4   ;;  %s2274_s16 = smov %s1536_s17 }
 0x263   : > { %s2275_s17 = smov %s1631_s28  ;;  %s2276_s18 = smov %s1544_s19 }
 0x264   : > { %s2277_s19 = smov %s2279_s23  ;;  %16 = sbr.rel (!%p14_p5) target bundleno = 4 (0x4), region = 84 }
 0x26b   :  { %1166 = vsyncpa [#allocation3], 1 }
 0x26c   :  { %1168 = vsyncpa [#allocation3 + $0x1], 1 }

</bundles_post_ra>
